<compile_context>
chip_gen: v7x
topology: tpu7x:2x2x1
jax: 0.10.0
libtpu: 0.0.40
codegen_flags: <defaults>
</compile_context>

<pallas_src>
import functools

import jax
import jax.numpy as jnp
import numpy as np
from jax import lax
from jax.experimental import pallas as pl
from jax.experimental.pallas import tpu as pltpu

_EPS = 1e-07
_PAD_SENTINEL = 1e8  # far-away coordinate for padded points (<< sqrt(f32 max))


def _round_up(x, m):
    return (x + m - 1) // m * m


def _infocd_kernel(x1_ref, x2_ref,
                   s1_ref, e1_ref, pmin2_ref,
                   min1_ref,
                   *, n1_valid, ti, tj):
    i = pl.program_id(1)
    j = pl.program_id(2)
    num_j = pl.num_programs(2)

    x1 = x1_ref[0]          # (TI, 4): [:, 0:3] coords,     [:, 3:4] ||a||^2
    x2 = x2_ref[0]          # (4, TJ): [0:3, :] -2*coords,  [3:4, :] ||b||^2

    # Pairwise squared distances for this (TI, TJ) tile, f32 on the VPU:
    #   sq = ||a||^2 + ||b||^2 + sum_k a_k * (-2 b_k)
    # (no clamp here -- applied only to the mins before sqrt, review opt 1).
    sq = x1[:, 3:4] + x2[3:4, :]
    sq = sq + x1[:, 0:1] * x2[0:1, :]
    sq = sq + x1[:, 1:2] * x2[1:2, :]
    sq = sq + x1[:, 2:3] * x2[2:3, :]        # (TI, TJ)

    # ---- direction 2: partial min over this i-tile, lane-dense -> HBM ------
    # Padded x1 rows hold the far sentinel so they never win the min.
    pmin2_ref[0, 0] = jnp.min(sq, axis=0, keepdims=True)       # (1, TJ)

    # ---- direction 1: lane-dense running min over x2 tiles (j axis) --------
    # (TI, 128) accumulator; fold each 128-lane column with a plain VPU min.
    m = jnp.where(j == 0,
                  jnp.full((ti, 128), jnp.inf, dtype=jnp.float32),
                  min1_ref[...])
    for c in range(tj // 128):
        m = jnp.minimum(m, sq[:, c * 128:(c + 1) * 128])
    min1_ref[...] = m

    # Finalize once per i-tile: single cross-lane min, then sqrt/exp/mask/sum.
    @pl.when(j == num_j - 1)
    def _finalize_dir1():
        dist1 = jnp.maximum(jnp.min(m, axis=1, keepdims=True), 0.0)  # (TI, 1)
        d = jnp.sqrt(dist1)
        e = jnp.exp(-0.5 * d)
        if n1_valid is not None:            # mask padded x1 points
            gi = i * ti + lax.broadcasted_iota(jnp.int32, (ti, 1), 0)
            valid = gi < n1_valid
            d = jnp.where(valid, d, 0.0)
            e = jnp.where(valid, e, 0.0)
        s1_ref[0, 0] = jnp.sum(d, axis=0, keepdims=True)
        e1_ref[0, 0] = jnp.sum(e, axis=0, keepdims=True)


def infocd_l1(xyz1, xyz2, ignore_zeros=False, *, ti=512, tj=2048):
    """InfoCD-L1 loss. xyz1: (B, N1, 3), xyz2: (B, N2, 3) -> scalar."""
    # TODO(synk): ignore_zeros (batch_size==1 dynamic non-zero-row filtering)
    # requires data-dependent shapes and is not expressible in a static grid.
    xyz1 = xyz1.astype(jnp.float32)
    xyz2 = xyz2.astype(jnp.float32)
    B, N1, _ = xyz1.shape
    B2, N2, _ = xyz2.shape
    assert B == B2

    # Tile sizes: sublane-aligned on the x1 axis, lane-aligned on the x2 axis.
    TI = _round_up(N1, 8) if N1 <= ti else ti
    TJ = _round_up(N2, 128) if N2 <= tj else tj
    N1p = _round_up(N1, TI)
    N2p = _round_up(N2, TJ)
    nI = N1p // TI
    nJ = N2p // TJ

    if N1p != N1:
        xyz1 = jnp.pad(xyz1, ((0, 0), (0, N1p - N1), (0, 0)),
                       constant_values=_PAD_SENTINEL)
    if N2p != N2:
        xyz2 = jnp.pad(xyz2, ((0, 0), (0, N2p - N2), (0, 0)),
                       constant_values=_PAD_SENTINEL)

    # O(N) wrapper precompute (NOT the pre-scale anti-pattern: kernel work is
    # O(N1*N2)): per-point squared norms and -2*coords, lane-dense for x2.
    sqn1 = jnp.sum(xyz1 * xyz1, axis=2, keepdims=True)            # (B, N1p, 1)
    x1aug = jnp.concatenate([xyz1, sqn1], axis=2)                 # (B, N1p, 4)
    x2t = jnp.transpose(xyz2, (0, 2, 1))                          # (B, 3, N2p)
    sqn2 = jnp.sum(xyz2 * xyz2, axis=2)[:, None, :]               # (B, 1, N2p)
    x2aug = jnp.concatenate([-2.0 * x2t, sqn2], axis=1)           # (B, 4, N2p)

    kernel = functools.partial(
        _infocd_kernel,
        n1_valid=(N1 if N1p != N1 else None),
        ti=TI, tj=TJ)

    s1, e1, pmin2 = pl.pallas_call(
        kernel,
        out_shape=(jax.ShapeDtypeStruct((B, nI, 1, 1), jnp.float32),
                   jax.ShapeDtypeStruct((B, nI, 1, 1), jnp.float32),
                   jax.ShapeDtypeStruct((B, nI, 1, N2p), jnp.float32)),
        grid_spec=pltpu.PrefetchScalarGridSpec(
            num_scalar_prefetch=0,
            grid=(B, nI, nJ),
            in_specs=[
                pl.BlockSpec((1, TI, 4), lambda b, i, j: (b, i, 0)),
                pl.BlockSpec((1, 4, TJ), lambda b, i, j: (b, 0, j)),
            ],
            out_specs=[
                pl.BlockSpec((1, 1, 1, 1), lambda b, i, j: (b, i, 0, 0)),
                pl.BlockSpec((1, 1, 1, 1), lambda b, i, j: (b, i, 0, 0)),
                pl.BlockSpec((1, 1, 1, TJ), lambda b, i, j: (b, i, 0, j)),
            ],
            scratch_shapes=[
                pltpu.VMEM((TI, 128), jnp.float32),   # lane-dense running min
            ],
        ),
        compiler_params=pltpu.CompilerParams(
            # b and i are both independent -> both TCs on v7x even for B == 1.
            dimension_semantics=("parallel", "parallel", "arbitrary"),
            vmem_limit_bytes=48 * 1024 * 1024,        # safe under v7x 64 MiB
        ),
    )(x1aug, x2aug)

    # Cheap JAX epilogue (O(B*(nI*N2 + N1)) work).
    s1 = s1.reshape(B, nI).sum(axis=1)                 # sum of sqrt(dist1)
    e1 = e1.reshape(B, nI).sum(axis=1)                 # sum of exp(-0.5*sqrt)

    dist2 = jnp.min(pmin2.reshape(B, nI, N2p), axis=1)[:, :N2]   # (B, N2)
    d2 = jnp.sqrt(jnp.maximum(dist2, 0.0))
    dd2 = jnp.exp(-0.5 * d2)
    s2 = jnp.sum(d2, axis=1)
    e2 = jnp.sum(dd2, axis=1)

    # distances = 0.5*sqrt(dist) + eps*log(sum(exp(-0.5*sqrt(dist))) + N*eps)
    log_s1 = jnp.log(e1 + N1 * _EPS)
    log_s2 = jnp.log(e2 + N2 * _EPS)
    mean1 = 0.5 * jnp.sum(s1) / (B * N1) + _EPS * jnp.mean(log_s1)
    mean2 = 0.5 * jnp.sum(s2) / (B * N2) + _EPS * jnp.mean(log_s2)
    return (mean1 + mean2) / 2.0


def _infocd_l1_ref(xyz1, xyz2):
    """Pure-JAX reference (mirrors the PyTorch expression exactly)."""
    sq = jnp.sum((xyz1[:, :, None, :] - xyz2[:, None, :, :]) ** 2, axis=-1)
    dist1 = jnp.min(sq, axis=2)   # (B, N1)
    dist2 = jnp.min(sq, axis=1)   # (B, N2)
    eps = 1e-07
    d1, d2 = jnp.sqrt(dist1), jnp.sqrt(dist2)
    dd1, dd2 = jnp.exp(-0.5 * d1), jnp.exp(-0.5 * d2)
    distances1 = -jnp.log(dd1 / (jnp.sum(dd1 + eps, axis=-1, keepdims=True) ** eps))
    distances2 = -jnp.log(dd2 / (jnp.sum(dd2 + eps, axis=-1, keepdims=True) ** eps))
    return (jnp.mean(distances1) + jnp.mean(distances2)) / 2.0


if __name__ == "__main__":
    key = jax.random.PRNGKey(0)
    k1, k2, k3, k4 = jax.random.split(key, 4)

    # Case 1: small clouds, single tile per batch element (lane padding masked).
    B, N1, N2 = 2, 16, 24
    xyz1 = jax.random.normal(k1, (B, N1, 3), dtype=jnp.float32)
    xyz2 = jax.random.normal(k2, (B, N2, 3), dtype=jnp.float32)
    loss = jax.block_until_ready(infocd_l1(xyz1, xyz2))
    ref = jax.block_until_ready(_infocd_l1_ref(xyz1, xyz2))
    np.testing.assert_allclose(np.asarray(loss), np.asarray(ref),
                               rtol=1e-4, atol=1e-5)

    # Case 2: multiple (i, j) tiles + ragged padding in both directions.
    B, N1, N2 = 2, 40, 300
    xyz1 = jax.random.normal(k3, (B, N1, 3), dtype=jnp.float32)
    xyz2 = jax.random.normal(k4, (B, N2, 3), dtype=jnp.float32)
    loss = jax.block_until_ready(infocd_l1(xyz1, xyz2, ti=16, tj=128))
    ref = jax.block_until_ready(_infocd_l1_ref(xyz1, xyz2))
    np.testing.assert_allclose(np.asarray(loss), np.asarray(ref),
                               rtol=1e-4, atol=1e-5)

    print("KERNEL_OK")
</pallas_src>

<mosaic_0001>
module attributes {stable_mosaic.version = 11 : i64} {
  func.func @_infocd_kernel(%arg0: i32, %arg1: i32, %arg2: i32, %arg3: memref<1x16x4xf32, #tpu.memory_space<vmem>>, %arg4: memref<1x4x128xf32, #tpu.memory_space<vmem>>, %arg5: memref<1x1x1x1xf32, #tpu.memory_space<vmem>>, %arg6: memref<1x1x1x1xf32, #tpu.memory_space<vmem>>, %arg7: memref<1x1x1x128xf32, #tpu.memory_space<vmem>>, %arg8: memref<16x128xf32, #tpu.memory_space<vmem>>) attributes {dimension_semantics = [#tpu.dimension_semantics<parallel>, #tpu.dimension_semantics<parallel>, #tpu.dimension_semantics<arbitrary>], iteration_bounds = array<i64: 2, 1, 1>, scalar_prefetch = 0 : i64, scratch_operands = 1 : i64, tpu.core_type = #tpu.core_type<tc>, window_params = [{transform_indices = @transform_0, window_bounds = array<i64: 1, 16, 4>}, {transform_indices = @transform_1, window_bounds = array<i64: 1, 4, 128>}, {transform_indices = @transform_2, window_bounds = array<i64: 1, 1, 1, 1>}, {transform_indices = @transform_3, window_bounds = array<i64: 1, 1, 1, 1>}, {transform_indices = @transform_4, window_bounds = array<i64: 1, 1, 1, 128>}]} {
    %c0 = arith.constant 0 : index
    %c0_0 = arith.constant 0 : index
    %c0_1 = arith.constant 0 : index
    %0 = vector.load %arg3[%c0, %c0_0, %c0_1] : memref<1x16x4xf32, #tpu.memory_space<vmem>>, vector<1x16x4xf32>
    %1 = vector.shape_cast %0 : vector<1x16x4xf32> to vector<16x4xf32>
    %c0_2 = arith.constant 0 : index
    %c0_3 = arith.constant 0 : index
    %c0_4 = arith.constant 0 : index
    %2 = vector.load %arg4[%c0_2, %c0_3, %c0_4] : memref<1x4x128xf32, #tpu.memory_space<vmem>>, vector<1x4x128xf32>
    %3 = vector.shape_cast %2 : vector<1x4x128xf32> to vector<4x128xf32>
    %4 = vector.extract_strided_slice %1 {offsets = [0, 3], sizes = [16, 1], strides = [1, 1]} : vector<16x4xf32> to vector<16x1xf32>
    %5 = vector.extract_strided_slice %3 {offsets = [3, 0], sizes = [1, 128], strides = [1, 1]} : vector<4x128xf32> to vector<1x128xf32>
    %6 = vector.broadcast %4 : vector<16x1xf32> to vector<16x128xf32>
    %7 = vector.broadcast %5 : vector<1x128xf32> to vector<16x128xf32>
    %8 = arith.addf %6, %7 : vector<16x128xf32>
    %9 = vector.extract_strided_slice %1 {offsets = [0, 0], sizes = [16, 1], strides = [1, 1]} : vector<16x4xf32> to vector<16x1xf32>
    %10 = vector.extract_strided_slice %3 {offsets = [0, 0], sizes = [1, 128], strides = [1, 1]} : vector<4x128xf32> to vector<1x128xf32>
    %11 = vector.broadcast %9 : vector<16x1xf32> to vector<16x128xf32>
    %12 = vector.broadcast %10 : vector<1x128xf32> to vector<16x128xf32>
    %13 = arith.mulf %11, %12 : vector<16x128xf32>
    %14 = arith.addf %8, %13 : vector<16x128xf32>
    %15 = vector.extract_strided_slice %1 {offsets = [0, 1], sizes = [16, 1], strides = [1, 1]} : vector<16x4xf32> to vector<16x1xf32>
    %16 = vector.extract_strided_slice %3 {offsets = [1, 0], sizes = [1, 128], strides = [1, 1]} : vector<4x128xf32> to vector<1x128xf32>
    %17 = vector.broadcast %15 : vector<16x1xf32> to vector<16x128xf32>
    %18 = vector.broadcast %16 : vector<1x128xf32> to vector<16x128xf32>
    %19 = arith.mulf %17, %18 : vector<16x128xf32>
    %20 = arith.addf %14, %19 : vector<16x128xf32>
    %21 = vector.extract_strided_slice %1 {offsets = [0, 2], sizes = [16, 1], strides = [1, 1]} : vector<16x4xf32> to vector<16x1xf32>
    %22 = vector.extract_strided_slice %3 {offsets = [2, 0], sizes = [1, 128], strides = [1, 1]} : vector<4x128xf32> to vector<1x128xf32>
    %23 = vector.broadcast %21 : vector<16x1xf32> to vector<16x128xf32>
    %24 = vector.broadcast %22 : vector<1x128xf32> to vector<16x128xf32>
    %25 = arith.mulf %23, %24 : vector<16x128xf32>
    %26 = arith.addf %20, %25 : vector<16x128xf32>
    %cst = arith.constant dense<0x7F800000> : vector<128xf32>
    %27 = vector.multi_reduction <minimumf>, %26, %cst [0] : vector<16x128xf32> to vector<128xf32>
    %28 = vector.shape_cast %27 : vector<128xf32> to vector<1x128xf32>
    %c0_5 = arith.constant 0 : index
    %c0_6 = arith.constant 0 : index
    %c0_7 = arith.constant 0 : index
    %c0_8 = arith.constant 0 : index
    %29 = vector.load %arg7[%c0_5, %c0_6, %c0_7, %c0_8] : memref<1x1x1x128xf32, #tpu.memory_space<vmem>>, vector<1x1x1x128xf32>
    %30 = vector.shape_cast %29 : vector<1x1x1x128xf32> to vector<1x128xf32>
    %31 = vector.shape_cast %28 : vector<1x128xf32> to vector<1x1x1x128xf32>
    tpu.vector_store %arg7[%c0_5, %c0_6, %c0_7, %c0_8], %31 {strides = array<i32>} : memref<1x1x1x128xf32, #tpu.memory_space<vmem>>, vector<1x1x1x128xf32>,
    %c0_i32 = arith.constant 0 : i32
    %32 = arith.cmpi eq, %arg2, %c0_i32 : i32
    %cst_9 = arith.constant 0x7F800000 : f32
    %33 = vector.broadcast %cst_9 : f32 to vector<16x128xf32>
    %c0_10 = arith.constant 0 : index
    %c0_11 = arith.constant 0 : index
    %34 = vector.load %arg8[%c0_10, %c0_11] : memref<16x128xf32, #tpu.memory_space<vmem>>, vector<16x128xf32>
    %35 = arith.select %32, %33, %34 : vector<16x128xf32>
    %36 = arith.minimumf %35, %26 : vector<16x128xf32>
    %c0_12 = arith.constant 0 : index
    %c0_13 = arith.constant 0 : index
    %37 = vector.load %arg8[%c0_12, %c0_13] : memref<16x128xf32, #tpu.memory_space<vmem>>, vector<16x128xf32>
    tpu.vector_store %arg8[%c0_12, %c0_13], %36 {strides = array<i32>} : memref<16x128xf32, #tpu.memory_space<vmem>>, vector<16x128xf32>,
    %c0_i32_14 = arith.constant 0 : i32
    %38 = arith.cmpi eq, %arg2, %c0_i32_14 : i32
    %39 = arith.extui %38 : i1 to i32
    %c0_i32_15 = arith.constant 0 : i32
    %40 = arith.cmpi ne, %39, %c0_i32_15 : i32
    scf.if %40 {
      %cst_16 = arith.constant dense<0x7F800000> : vector<16xf32>
      %41 = vector.multi_reduction <minimumf>, %36, %cst_16 [1] : vector<16x128xf32> to vector<16xf32>
      %42 = vector.shape_cast %41 : vector<16xf32> to vector<16x1xf32>
      %cst_17 = arith.constant 0.000000e+00 : f32
      %43 = vector.broadcast %cst_17 : f32 to vector<16x1xf32>
      %44 = arith.maximumf %42, %43 : vector<16x1xf32>
      %45 = math.sqrt %44 : vector<16x1xf32>
      %cst_18 = arith.constant -5.000000e-01 : f32
      %46 = vector.broadcast %cst_18 : f32 to vector<16x1xf32>
      %47 = arith.mulf %46, %45 : vector<16x1xf32>
      %48 = math.exp %47 : vector<16x1xf32>
      %cst_19 = arith.constant dense<0.000000e+00> : vector<1xf32>
      %49 = vector.multi_reduction <add>, %45, %cst_19 [0] : vector<16x1xf32> to vector<1xf32>
      %50 = vector.shape_cast %49 : vector<1xf32> to vector<1x1xf32>
      %c0_20 = arith.constant 0 : index
      %c0_21 = arith.constant 0 : index
      %c0_22 = arith.constant 0 : index
      %c0_23 = arith.constant 0 : index
      %51 = vector.load %arg5[%c0_20, %c0_21, %c0_22, %c0_23] : memref<1x1x1x1xf32, #tpu.memory_space<vmem>>, vector<1x1x1x1xf32>
      %52 = vector.shape_cast %51 : vector<1x1x1x1xf32> to vector<1x1xf32>
      %53 = vector.shape_cast %50 : vector<1x1xf32> to vector<1x1x1x1xf32>
      tpu.vector_store %arg5[%c0_20, %c0_21, %c0_22, %c0_23], %53 {strides = array<i32>} : memref<1x1x1x1xf32, #tpu.memory_space<vmem>>, vector<1x1x1x1xf32>,
      %cst_24 = arith.constant dense<0.000000e+00> : vector<1xf32>
      %54 = vector.multi_reduction <add>, %48, %cst_24 [0] : vector<16x1xf32> to vector<1xf32>
      %55 = vector.shape_cast %54 : vector<1xf32> to vector<1x1xf32>
      %c0_25 = arith.constant 0 : index
      %c0_26 = arith.constant 0 : index
      %c0_27 = arith.constant 0 : index
      %c0_28 = arith.constant 0 : index
      %56 = vector.load %arg6[%c0_25, %c0_26, %c0_27, %c0_28] : memref<1x1x1x1xf32, #tpu.memory_space<vmem>>, vector<1x1x1x1xf32>
      %57 = vector.shape_cast %56 : vector<1x1x1x1xf32> to vector<1x1xf32>
      %58 = vector.shape_cast %55 : vector<1x1xf32> to vector<1x1x1x1xf32>
      tpu.vector_store %arg6[%c0_25, %c0_26, %c0_27, %c0_28], %58 {strides = array<i32>} : memref<1x1x1x1xf32, #tpu.memory_space<vmem>>, vector<1x1x1x1xf32>,
    } else {
    }
    return
  }
  func.func @transform_0(%arg0: i32, %arg1: i32, %arg2: i32) -> (i32, i32, i32) {
    %c0_i32 = arith.constant 0 : i32
    %c0_i32_0 = arith.constant 0 : i32
    return %arg0, %arg1, %c0_i32 : i32, i32, i32
  }
  func.func @transform_1(%arg0: i32, %arg1: i32, %arg2: i32) -> (i32, i32, i32) {
    %c0_i32 = arith.constant 0 : i32
    %c0_i32_0 = arith.constant 0 : i32
    return %arg0, %c0_i32, %arg2 : i32, i32, i32
  }
  func.func @transform_2(%arg0: i32, %arg1: i32, %arg2: i32) -> (i32, i32, i32, i32) {
    %c0_i32 = arith.constant 0 : i32
    %c0_i32_0 = arith.constant 0 : i32
    %c0_i32_1 = arith.constant 0 : i32
    return %arg0, %arg1, %c0_i32, %c0_i32_0 : i32, i32, i32, i32
  }
  func.func @transform_3(%arg0: i32, %arg1: i32, %arg2: i32) -> (i32, i32, i32, i32) {
    %c0_i32 = arith.constant 0 : i32
    %c0_i32_0 = arith.constant 0 : i32
    %c0_i32_1 = arith.constant 0 : i32
    return %arg0, %arg1, %c0_i32, %c0_i32_0 : i32, i32, i32, i32
  }
  func.func @transform_4(%arg0: i32, %arg1: i32, %arg2: i32) -> (i32, i32, i32, i32) {
    %c0_i32 = arith.constant 0 : i32
    %c0_i32_0 = arith.constant 0 : i32
    return %arg0, %arg1, %c0_i32, %arg2 : i32, i32, i32, i32
  }
}

</mosaic_0001>

<bundles_post_ra>
// kernel: tpu_custom_call.1
= control target key start
LH: loop header
LB: loop body
LE: loop exit
PB: predicated region body
PF: predicated region fallthrough
CT: control target
= control target key end

     0   :  { %10 = vsyncpa [#allocation4], 0  ;;  %s918_s0 = inlined_call_operand.vmem [shape: f32[2,16,4], index: 0, kind: input, shape index: {}]   ;;  %s919_s1 = inlined_call_operand.vmem [shape: f32[2,4,128], index: 1, kind: input, shape index: {}]   ;;  %s920_s2 = inlined_call_operand.vmem [shape: f32[2,1,1,1], index: 2, kind: output, shape index: {0}]   ;;  %s921_s3 = inlined_call_operand.vmem [shape: f32[2,1,1,1], index: 3, kind: output, shape index: {1}]   ;;  %s922_s4 = inlined_call_operand.hbm [shape: f32[2,1,1,128], index: 4, kind: output, shape index: {2}]  }
   0x1   :  { %12 = vsyncpa [#allocation4 + $0x1], 0  ;;  %s797_s15 = smov 0   ;;  %s799_s16 = smov 0  }
   0x2   :  { %s801_s17 = smov 0   ;;  %s803_s18 = smov 0  }
   0x3   :  { %s805_s19 = smov 0   ;;  %s807_s20 = smov 0  }
   0x4 LB: > { %s602_s21 = sadd.s32 4294967295, %s765_s20   ;;  %s603_s22 = sadd.s32 4294967294, %s765_s20   ;;  %s765_s20 = sphi %s807_s20, %s18_s20   ;;  %s761_s19 = sphi %s805_s19, %s929_s19   ;;  %s757_s18 = sphi %s803_s18, %s928_s18   ;;  %s753_s17 = sphi %s801_s17, %s927_s17   ;;  %s749_s16 = sphi %s799_s16, %s926_s16   ;;  %s745_s15 = sphi %s797_s15, %s925_s15  }
   0x5   : > { %s37_s23 = sadd.s32 1, %s761_s19  ;;  %s160_s24 = sadd.s32 1, %s753_s17 }
   0x6   : > { %p39_p0 = scmp.ge.s32.totalorder %s37_s23, 2  ;;  %p170_p1 = scmp.ne.s32.totalorder %s753_s17, %s749_s16 }
   0x7   : > { %p171_p2 = scmp.eq.s32.totalorder %s602_s21, 1  ;;  %p176_p3 = scmp.ne.s32.totalorder %s749_s16, %s745_s15 }
   0x8   : > { %s931_s23 = smov (%p39_p0, %s37_s23), 0  ;;  %p177_p5 = scmp.eq.s32.totalorder %s603_s22, 1 }
   0x9   : > { %p837_p4 = por %p171_p2, %p170_p1  ;;  %s153_s26 = ssub.s32 %s761_s19, %s931_s23 }
   0xa   : > { %p606_p6 = scmp.ge.s32.totalorder %s765_s20, 1  ;;  %p158_p7 = scmp.eq.s32.totalorder %s153_s26, 0 }
   0xb   : > { %p844_p8 = por %p177_p5, %p176_p3  ;;  %p218_p9 = scmp.lt.s32.totalorder %s765_s20, 3 }
   0xc   : > { %s850_s28 = scalar_select %p158_p7, %s753_s17, %s160_s24  }
   0xd   : > { %p219_p10 = pnand %p606_p6, %p218_p9 }
   0xe   : > { %p267_p11 = scmp.lt.s32.totalorder (!%p219_p10), %s757_s18, 1  ;;  %v767_v0 = vmov (!%p219_p10), 0   ;;  %v768_v1 = vmov (!%p219_p10), 3   ;;  %v769_v4 = vmov (!%p219_p10), 1   ;;  %v770_v5 = vmov (!%p219_p10), 2   ;;  %s264_s12 = sand.u32 (!%p219_p10), 1, %s749_s16  }
   0xf   : > { %222 = sbr.rel (%p219_p10) target bundleno = 363 (0x16b), region = 28  ;;  %674 = vset.pattern.permute.xlu1 (!%p219_p10), %v767_v0  ;;  %673 = vset.pattern.permute.xlu0 (!%p219_p10), %v768_v1  ;;  %v308_v6 = vlaneseq (!%p219_p10)  ;;  %s265_s13 = scalar_lea.vmem (!%p219_p10), [#allocation3], %s264_s12 }
  0x10   : > { %s610_s14 = sshll.u32 (!%p219_p10), %s757_s18, 4  ;;  %s461_s21 = sshll.u32 (!%p219_p10), %s265_s13, 4  ;;  %s462_s21 = int_to_ptr.vmem [resolvable:$true] %s461_s21 }
  0x11   : > { %v309_v7 = vshrl.u32 (!%p219_p10), %v308_v6, 7  ;;  %s869_s26 = scalar_lea.hbm (!%p219_p10), %s922_s4, %s610_s14  ;;  %s687_s5 = scalar_lea.vmem (!%p219_p10), %s462_s21, 16 }
  0x12   : > { %p688_p12 = scmp.ne.s32.totalorder (!%p219_p10), %s462_s21, %s687_s5  ;;  %s771_s6 = smov (!%p219_p10), [#allocation3]  }
  0x13   : > { %v324_v10 = vsub.s32 (!%p219_p10), 0, %v309_v7  ;;  %v310_v11 = vsub.s32 (!%p219_p10), 3, %v309_v7  ;;  %v340_v13 = vsub.s32 (!%p219_p10), 1, %v309_v7  ;;  %v356_v19 = vsub.s32 (!%p219_p10), 2, %v309_v7 }
  0x14   : > { %p689_p13 = pnand (!%p219_p10), %p688_p12, %p837_p4 }
  0x16   : > { %s854_s29 = scalar_select %p267_p11, %s757_s18, 1 }
  0x17   : > { %p690_p0 = pneg %p689_p13 }
  0x18   : > { %s613_s30 = sshll.u32 %s854_s29, 4  ;;  %s609_s8 = sshll.u32 %s854_s29, 2 }
  0x19   : > { %s274_s7 = scalar_lea.vmem %s918_s0, %s613_s30  ;;  %s282_s11 = scalar_lea.vmem %s919_s1, %s609_s8 }
  0x1a   : > { %v295_v2 = vld [vmem:[%s274_s7] sm:$0xff]  ;;  %v296_v3 = vld [vmem:[%s274_s7 + $0x8] sm:$0xff]  ;;  %s441_s30 = scalar_lea.sflag [#allocation4], %s264_s12  ;;  %s691_s7 = sshll.u32 %s771_s6, 4  ;;  %s692_s7 = int_to_ptr.vmem [resolvable:$false] %s691_s7 }
  0x1b   : > { %315 = vperm.xlu1 %674, %v295_v2   ;;  %300 = vperm.xlu0 %673, %v295_v2   ;;  %v297_v12 = vld [vmem:[%s282_s11] sm:$0xf]  ;;  %s693_s8 = scalar_lea.vmem %s692_s7, 32  ;;  %p694_p1 = scmp.lt.s32.totalorder %s462_s21, %s692_s7 }
  0x1c   : > { %v325_v16 = vrot.slane %v297_v12, %v324_v10  ;;  %v311_v17 = vrot.slane %v297_v12, %v310_v11  ;;  %v341_v18 = vrot.slane %v297_v12, %v340_v13  ;;  %v357_v28 = vrot.slane %v297_v12, %v356_v19  ;;  %p695_p2 = scmp.lt.s32.totalorder %s693_s8, %s687_s5 }
  0x1e   : > { %p696_p3 = por %p695_p2, %p694_p1 }
  0x1f   : > { %319 = vperm.xlu1 %674, %v296_v3   ;;  %305 = vperm.xlu0 %673, %v296_v3  }
  0x20   : > { %p697_p5 = pnand %p696_p3, %p690_p0 }
  0x23   : > { %676 = vset.pattern.permute.xlu1 %v769_v4  ;;  %675 = vset.pattern.permute.xlu0 %v769_v4 }
  0x24   : > { %335 = vperm.xlu1 %676, %v296_v3   ;;  %331 = vperm.xlu0 %675, %v295_v2  }
  0x28   : > { %677 = vset.pattern.permute.xlu1 %v770_v5  ;;  %678 = vset.pattern.permute.xlu0 %v770_v5 }
  0x29   : > { %347 = vperm.xlu1 %677, %v295_v2   ;;  %351 = vperm.xlu0 %678, %v296_v3  }
  0x9a   : > { %v316_v8 = vpop.permute.xlu1 %315  ;;  %v301_v9 = vpop.permute.xlu0 %300 }
  0x9b   : > { %v326_v20 = vmul.f32 %v325_v16, %v316_v8  ;;  %v312_v21 = vadd.f32 %v311_v17, %v301_v9 }
  0x9d   : > { %v328_v29 = vadd.f32 %v326_v20, %v312_v21 }
  0x9e   : > { %v320_v14 = vpop.permute.xlu1 %319  ;;  %v306_v15 = vpop.permute.xlu0 %305 }
  0x9f   : > { %v327_v22 = vmul.f32 %v325_v16, %v320_v14  ;;  %v313_v23 = vadd.f32 %v311_v17, %v306_v15 }
  0xa1   : > { %v329_v30 = vadd.f32 %v327_v22, %v313_v23 }
  0xa3   : > { %v336_v24 = vpop.permute.xlu1 %335  ;;  %v332_v25 = vpop.permute.xlu0 %331 }
  0xa4   : > { %v343_v26 = vmul.f32 %v341_v18, %v336_v24  ;;  %v342_v27 = vmul.f32 %v341_v18, %v332_v25 }
  0xa6   : > { %v345_v33 = vadd.f32 %v343_v26, %v329_v30  ;;  %v344_v34 = vadd.f32 %v342_v27, %v328_v29 }
  0xa8   : > { %v348_v31 = vpop.permute.xlu1 %347  ;;  %v352_v32 = vpop.permute.xlu0 %351 }
  0xa9   : > { %v358_v35 = vmul.f32 %v357_v28, %v348_v31  ;;  %v359_v36 = vmul.f32 %v357_v28, %v352_v32 }
  0xab   : > { %v360_v37 = vadd.f32 %v358_v35, %v344_v34  ;;  %v361_v38 = vadd.f32 %v359_v36, %v345_v33 }
  0xad   : > { %385 = vmin.xlane.f32.xlu1 %v360_v37  ;;  %387 = vmin.xlane.f32.xlu0 %v361_v38  ;;  %v362_v39 = vmin.f32 %v360_v37, %v361_v38 }
  0xaf   : > { %v363_v40 = vrot.slane %v362_v39, 4 }
  0xb1   : > { %v364_v41 = vmin.f32 %v362_v39, %v363_v40 }
  0xb3   : > { %v365_v42 = vrot.slane %v364_v41, 2 }
  0xb5   : > { %v366_v43 = vmin.f32 %v364_v41, %v365_v42 }
  0xb7   : > { %v367_v44 = vrot.slane %v366_v43, 1 }
  0xb9   : > { %v368_v45 = vmin.f32 %v366_v43, %v367_v44 }
  0xbb   : > { %369 = vst [vmem:[%s265_s13] sm:$0x1] %v368_v45 }
  0xbc   : > { %700 = shalt.err (!%p697_p5)
}
  0xbd   : > { %s701_s18 = scalar_lea.hbm %s869_s26, 16  ;;  %s705_s11 = scalar_lea.hbm %s922_s4, 32 }
  0xbe   : > { %p702_p6 = scmp.ne.s32.totalorder %s869_s26, %s701_s18  ;;  %p706_p10 = scmp.lt.u32.totalorder %s869_s26, %s922_s4 }
  0xbf   : > { %p707_p11 = scmp.lt.u32.totalorder %s705_s11, %s701_s18  ;;  %p709_p13 = scmp.lt.u32.totalorder %s701_s18, %s869_s26 }
  0xc0   : > { %p703_p7 = pnand %p702_p6, %p837_p4 }
  0xc1   : > { %p708_p12 = por %p707_p11, %p706_p10 }
  0xc2   : > { %p704_p9 = pneg %p703_p7 }
  0xc3   : > { %p710_p0 = por %p709_p13, %p708_p12 }
  0xc5   : > { %p711_p1 = pnand %p710_p0, %p704_p9 }
  0xc7   : > { %714 = shalt.err (!%p711_p1)
}
  0xc8   : > { %614 = dma.vmem_to_hbm [thread:$0]  (%p837_p4), %s462_s21, 16, %s869_s26, %s441_s30   ;;  %vm418_vm4 = vcmask 0  }
  0xc9   : > { %s288_s21 = scalar_lea.vmem %s920_s2, %s854_s29  ;;  %s294_s26 = scalar_lea.vmem %s921_s3, %s854_s29 }
 0x13a   : > { %v386_v46 = vpop.xlane.xlu1 %385  ;;  %v388_v47 = vpop.xlane.xlu0 %387 }
 0x13b   : > { %v389_v48 = vmax.f32 %v386_v46, 0.0  ;;  %v390_v49 = vmax.f32 %v388_v47, 0.0 }
 0x13d   : > { %679 = vrsqrt.f32 %v389_v48  ;;  %vm393_vm0 = vcmp.eq.f32.partialorder %v389_v48, inf  ;;  %v396_v53 = vand.u32 2147483648, %v389_v48  ;;  %vm395_vm1 = vcmp.eq.f32.partialorder %v389_v48, 0.0 }
 0x13e   : > { %681 = vrsqrt.f32 %v390_v49  ;;  %vm400_vm2 = vcmp.eq.f32.partialorder %v390_v49, inf  ;;  %v403_v56 = vand.u32 2147483648, %v390_v49  ;;  %vm402_vm3 = vcmp.eq.f32.partialorder %v390_v49, 0.0 }
 0x147   : > { %v680_v50 = vpop.eup %679 }
 0x148   : > { %v682_v51 = vpop.eup %681  ;;  %v392_v52 = vmul.f32 %v680_v50, %v389_v48 }
 0x149   : > { %v399_v54 = vmul.f32 %v682_v51, %v390_v49 }
 0x14a   : > { %v394_v55 = vsel %vm393_vm0, %v389_v48, %v392_v52 }
 0x14b   : > { %v397_v57 = vsel %vm395_vm1, %v396_v53, %v394_v55  ;;  %v401_v58 = vsel %vm400_vm2, %v390_v49, %v399_v54 }
 0x14c   : > { %v405_v59 = vmul.f32 -0.5, %v397_v57  ;;  %v404_v60 = vsel %vm402_vm3, %v403_v56, %v401_v58 }
 0x14d   : > { %v406_v61 = vmul.f32 -0.5, %v404_v60  ;;  %v411_v62 = vadd.f32 %v404_v60, %v397_v57 }
 0x14e   : > { %v407_v63 = vmul.f32 1.442695, %v405_v59 }
 0x14f   : > { %v409_v0 = vmul.f32 1.442695, %v406_v61  ;;  %v412_v1 = vrot.slane %v411_v62, 4 }
 0x150   : > { %683 = vpow2.f32 %v407_v63 }
 0x151   : > { %685 = vpow2.f32 %v409_v0  ;;  %v413_v2 = vadd.f32 %v412_v1, %v411_v62 }
 0x153   : > { %v414_v3 = vrot.slane %v413_v2, 2 }
 0x155   : > { %v415_v4 = vadd.f32 %v414_v3, %v413_v2 }
 0x157   : > { %v416_v5 = vrot.slane %v415_v4, 1 }
 0x159   : > { %v417_v6 = vadd.f32 %v416_v5, %v415_v4 }
 0x15a   : > { %v684_v7 = vpop.eup %683 }
 0x15b   : > { %v686_v8 = vpop.eup %685  ;;  %419 = vst.msk [vmem:[%s288_s21] sm:$0x1] %vm418_vm4, %v417_v6 }
 0x15c   : > { %v420_v9 = vadd.f32 %v686_v8, %v684_v7 }
 0x15e   : > { %v421_v10 = vrot.slane %v420_v9, 4 }
 0x160   : > { %v422_v11 = vadd.f32 %v421_v10, %v420_v9 }
 0x162   : > { %v423_v12 = vrot.slane %v422_v11, 2 }
 0x164   : > { %v424_v13 = vadd.f32 %v423_v12, %v422_v11 }
 0x166   : > { %v425_v14 = vrot.slane %v424_v13, 1 }
 0x168   : > { %v426_v15 = vadd.f32 %v425_v14, %v424_v13 }
 0x16a   : > { %427 = vst.msk [vmem:[%s294_s26] sm:$0x1] %vm418_vm4, %v426_v15 }
 0x16b PF: > { %p620_p4 = scmp.ge.s32.totalorder %s765_s20, 2  ;;  %s491_s30 = sand.u32 1, %s745_s15  }
 0x16c   : > { %s492_s5 = scalar_lea.sflag [#allocation4], %s491_s30 }
 0x16d   : > { %p617_p2 = pnand %p620_p4, %p844_p8 }
 0x16f   : > { %740 = dma.done.wait (!%p617_p2), %s492_s5, 16  }
 0x170   : > { %742 = vsyncadd (!%p617_p2), %s492_s5, 4294967280  ;;  %s18_s20 = sadd.s32 1, %s765_s20   ;;  %s925_s15 = smov %s749_s16 }
 0x171   : > { %p15_p3 = scmp.ge.s32.totalorder %s18_s20, 4   ;;  %s926_s16 = smov %s753_s17 }
 0x172   : > { %s927_s17 = smov %s850_s28  ;;  %s928_s18 = smov %s761_s19 }
 0x173   : > { %s929_s19 = smov %s931_s23  ;;  %17 = sbr.rel (!%p15_p3) target bundleno = 4 (0x4), region = 94 }
 0x17a   :  { %496 = vsyncpa [#allocation4], 1 }
 0x17b   :  { %498 = vsyncpa [#allocation4 + $0x1], 1 }

</bundles_post_ra>
